<compile_context>
chip_gen: v6e
topology: v6e:2x2x1
jax: 0.10.0
libtpu: 0.0.40
codegen_flags: <defaults>
</compile_context>

<pallas_src>
import functools

import jax
import jax.numpy as jnp
from jax.experimental import pallas as pl
from jax.experimental.pallas import tpu as pltpu


_VMEM_LIMIT_BYTES = 48 * 1024 * 1024      # explicit scoped-VMEM limit
_TILE_VMEM_BUDGET = 32 * 1024 * 1024      # budget for all double-buffered blocks


def _round_up(x: int, m: int) -> int:
    return -(-x // m) * m


def _choose_tile_n(n: int, c: int, itemsize: int) -> int:
    """Row-tile size: sublane-packed, VMEM-budgeted, >=2 tiles when possible."""
    sub = max(8, 32 // itemsize)                      # 8 f32, 16 bf16, 32 int8/fp8
    # Per tile row, double-buffered: logits row (c*itemsize) plus lane-padded
    # (tile_n, 1) blocks for labels / per-row weight / 'none' output
    # (each ~128 lanes * 4 B = 512 B per buffer).
    per_row = c * itemsize + 3 * 512
    t = _TILE_VMEM_BUDGET // (2 * per_row)
    t = max(sub, (t // sub) * sub)
    # Keep >= 2 balanced tiles so both v7x TensorCores get work (megacore).
    half = _round_up(max(1, -(-n // 2)), sub)
    t = min(t, max(sub, half))
    # Never exceed the (sublane-rounded) problem size.
    t = min(t, _round_up(max(n, 1), sub))
    return max(sub, t)


def _poly1_ce_kernel(*refs, epsilon: float, reduction: str, n_true: int,
                     tile_n: int, has_weight: bool):
    if has_weight:
        logits_ref, labels_ref, roww_ref, out_ref = refs
    else:
        logits_ref, labels_ref, out_ref = refs
        roww_ref = None

    logits = logits_ref[...].astype(jnp.float32)        # [t, C]
    labels = labels_ref[...]                            # [t, 1] int32
    t, c = logits.shape

    # Numerically stable softmax statistics (no full log-softmax tensor).
    m = jnp.max(logits, axis=-1, keepdims=True)                         # [t,1]
    shifted = logits - m                                                # [t,C]
    sumexp = jnp.sum(jnp.exp(shifted), axis=-1, keepdims=True)          # [t,1]

    # One-hot gather of the target-class shifted logit via a lane iota.
    cls_idx = jax.lax.broadcasted_iota(jnp.int32, (t, c), 1)            # [t,C]
    onehot = cls_idx == labels                                          # [t,C]
    shifted_y = jnp.sum(jnp.where(onehot, shifted, 0.0),
                        axis=-1, keepdims=True)                         # [t,1]

    logp_y = shifted_y - jnp.log(sumexp)                                # [t,1]
    pt = jnp.exp(logp_y)                                                # exact

    if has_weight:
        ce = -roww_ref[...].astype(jnp.float32) * logp_y                # [t,1]
    else:
        ce = -logp_y

    poly1 = ce + epsilon * (1.0 - pt)                                   # [t,1]

    if reduction == "none":
        # Direct per-row column store; Pallas drops out-of-bounds rows of the
        # ragged last block, so no extra masking is needed here.
        out_ref[...] = poly1.astype(out_ref.dtype)
    else:
        # Per-tile partial sum; ragged-block rows (unspecified logits) are
        # masked with a select against the true N so NaN/Inf cannot leak.
        row_start = pl.program_id(0) * tile_n
        rid = jax.lax.broadcasted_iota(jnp.int32, (t, 1), 0)
        valid = (row_start + rid) < n_true
        partial = jnp.sum(jnp.where(valid, poly1, 0.0))
        out_ref[...] = jnp.broadcast_to(partial, out_ref.shape).astype(out_ref.dtype)


def poly1_cross_entropy_loss(logits, labels, *, num_classes, epsilon=0.01,
                             reduction="mean", weight=None):
    """Pallas implementation of Poly1CrossEntropyLoss.forward."""
    assert reduction in ("mean", "sum", "none")
    n, c = logits.shape
    assert c == num_classes, "logits last dim must equal num_classes"
    has_weight = weight is not None

    itemsize = jnp.dtype(logits.dtype).itemsize
    tile_n = _choose_tile_n(n, c, itemsize)
    num_tiles = pl.cdiv(n, tile_n)

    labels_i32 = jnp.asarray(labels, dtype=jnp.int32).reshape(n)
    labels_2d = labels_i32.reshape(n, 1)

    args = [logits, labels_2d]
    in_specs = [
        pl.BlockSpec((tile_n, c), lambda i: (i, 0)),   # logits tile (native dtype)
        pl.BlockSpec((tile_n, 1), lambda i: (i, 0)),   # labels tile
    ]
    if has_weight:
        # Tiny XLA gather outside the kernel; streamed as a per-row column so
        # the kernel avoids a second [t, C] select + lane reduction.
        w_rows = jnp.take(jnp.asarray(weight, jnp.float32), labels_i32,
                          axis=0).reshape(n, 1)
        args.append(w_rows)
        in_specs.append(pl.BlockSpec((tile_n, 1), lambda i: (i, 0)))

    if reduction == "none":
        out_shape = jax.ShapeDtypeStruct((n, 1), jnp.float32)
        out_specs = pl.BlockSpec((tile_n, 1), lambda i: (i, 0))
    else:
        out_shape = jax.ShapeDtypeStruct((num_tiles, 1, 128), jnp.float32)
        out_specs = pl.BlockSpec((1, 1, 128), lambda i: (i, 0, 0))

    kernel = functools.partial(
        _poly1_ce_kernel, epsilon=float(epsilon), reduction=reduction,
        n_true=n, tile_n=tile_n, has_weight=has_weight)

    out_bytes = (n * 4) if reduction == "none" else (num_tiles * 128 * 4)
    bytes_accessed = (n * c * itemsize + n * 4
                      + (n * 4 if has_weight else 0) + out_bytes)
    cost = pl.CostEstimate(flops=6 * n * c, transcendentals=n * c,
                           bytes_accessed=int(bytes_accessed))

    out = pl.pallas_call(
        kernel,
        out_shape=out_shape,
        grid=(num_tiles,),
        in_specs=in_specs,
        out_specs=out_specs,
        compiler_params=pltpu.CompilerParams(
            dimension_semantics=("parallel",),
            vmem_limit_bytes=_VMEM_LIMIT_BYTES),
        cost_estimate=cost,
    )(*args)

    if reduction == "none":
        return out.reshape(-1).astype(logits.dtype)
    total = jnp.sum(out[:, 0, 0])       # finish the tiny partial-sum reduce in f32
    if reduction == "mean":
        total = total / n               # divide by the true N (module semantics)
    return total.astype(logits.dtype)


def _reference(logits, labels, *, num_classes, epsilon, reduction, weight=None):
    """Pure-JAX reference mirroring the PyTorch module."""
    onehot = jax.nn.one_hot(labels, num_classes, dtype=logits.dtype)
    pt = jnp.sum(onehot * jax.nn.softmax(logits, axis=-1), axis=-1)
    logp = jax.nn.log_softmax(logits, axis=-1)
    w = jnp.ones((num_classes,), logits.dtype) if weight is None else weight
    ce = -jnp.take_along_axis(logp, labels[:, None], axis=-1)[:, 0] * w[labels]
    poly1 = ce + epsilon * (1.0 - pt)
    if reduction == "mean":
        return poly1.mean()
    if reduction == "sum":
        return poly1.sum()
    return poly1


if __name__ == "__main__":
    EPS = 0.01
    key = jax.random.PRNGKey(0)
    k1, k2, k3 = jax.random.split(key, 3)

    # Small single-tile case (matches the module's [N, num_classes] contract).
    N1, C1 = 8, 16
    logits1 = jax.random.normal(k1, (N1, C1), dtype=jnp.float32)
    labels1 = jax.random.randint(k2, (N1,), 0, C1, dtype=jnp.int32)

    # Larger case exercising the grid, ragged last block and class weights.
    N2, C2 = 300, 160
    logits2 = jax.random.normal(k2, (N2, C2), dtype=jnp.float32)
    labels2 = jax.random.randint(k3, (N2,), 0, C2, dtype=jnp.int32)
    weight2 = jax.random.uniform(k1, (C2,), jnp.float32, 0.5, 1.5)

    cases = [
        (logits1, labels1, None),
        (logits2, labels2, None),
        (logits2, labels2, weight2),
    ]
    for lg, lb, w in cases:
        for red in ("mean", "sum", "none"):
            got = poly1_cross_entropy_loss(
                lg, lb, num_classes=lg.shape[1], epsilon=EPS,
                reduction=red, weight=w)
            got = jax.block_until_ready(got)
            ref = _reference(lg, lb, num_classes=lg.shape[1], epsilon=EPS,
                             reduction=red, weight=w)
            assert jnp.allclose(got, ref, rtol=1e-5, atol=1e-5), (red, got, ref)

    print("KERNEL_OK")
</pallas_src>

<mosaic_0001>
module attributes {stable_mosaic.version = 11 : i64} {
  func.func @_poly1_ce_kernel(%arg0: i32, %arg1: memref<8x16xf32, #tpu.memory_space<vmem>>, %arg2: memref<8x1xi32, #tpu.memory_space<vmem>>, %arg3: memref<1x1x128xf32, #tpu.memory_space<vmem>>) attributes {dimension_semantics = [#tpu.dimension_semantics<parallel>], iteration_bounds = array<i64: 1>, scalar_prefetch = 0 : i64, scratch_operands = 0 : i64, tpu.core_type = #tpu.core_type<tc>, window_params = [{transform_indices = @transform_0, window_bounds = array<i64: 8, 16>}, {transform_indices = @transform_1, window_bounds = array<i64: 8, 1>}, {transform_indices = @transform_2, window_bounds = array<i64: 1, 1, 128>}]} {
    %c0 = arith.constant 0 : index
    %c0_0 = arith.constant 0 : index
    %0 = vector.load %arg1[%c0, %c0_0] : memref<8x16xf32, #tpu.memory_space<vmem>>, vector<8x16xf32>
    %c0_1 = arith.constant 0 : index
    %c0_2 = arith.constant 0 : index
    %1 = vector.load %arg2[%c0_1, %c0_2] : memref<8x1xi32, #tpu.memory_space<vmem>>, vector<8x1xi32>
    %cst = arith.constant dense<0xFF800000> : vector<8xf32>
    %2 = vector.multi_reduction <maximumf>, %0, %cst [1] : vector<8x16xf32> to vector<8xf32>
    %3 = vector.shape_cast %2 : vector<8xf32> to vector<8x1xf32>
    %4 = vector.broadcast %3 : vector<8x1xf32> to vector<8x16xf32>
    %5 = arith.subf %0, %4 : vector<8x16xf32>
    %6 = math.exp %5 : vector<8x16xf32>
    %cst_3 = arith.constant dense<0.000000e+00> : vector<8xf32>
    %7 = vector.multi_reduction <add>, %6, %cst_3 [1] : vector<8x16xf32> to vector<8xf32>
    %8 = vector.shape_cast %7 : vector<8xf32> to vector<8x1xf32>
    %9 = tpu.iota {dimensions = array<i32: 1>} : vector<8x16xi32>
    %10 = vector.broadcast %1 : vector<8x1xi32> to vector<8x16xi32>
    %11 = arith.cmpi eq, %9, %10 : vector<8x16xi32>
    %cst_4 = arith.constant 0.000000e+00 : f32
    %12 = vector.broadcast %cst_4 : f32 to vector<8x16xf32>
    %13 = arith.select %11, %5, %12 : vector<8x16xi1>, vector<8x16xf32>
    %cst_5 = arith.constant dense<0.000000e+00> : vector<8xf32>
    %14 = vector.multi_reduction <add>, %13, %cst_5 [1] : vector<8x16xf32> to vector<8xf32>
    %15 = vector.shape_cast %14 : vector<8xf32> to vector<8x1xf32>
    %16 = math.log %8 : vector<8x1xf32>
    %17 = arith.subf %15, %16 : vector<8x1xf32>
    %18 = math.exp %17 : vector<8x1xf32>
    %cst_6 = arith.constant 0.000000e+00 : f32
    %19 = vector.broadcast %cst_6 : f32 to vector<8x1xf32>
    %20 = arith.subf %19, %17 : vector<8x1xf32>
    %cst_7 = arith.constant 1.000000e+00 : f32
    %21 = vector.broadcast %cst_7 : f32 to vector<8x1xf32>
    %22 = arith.subf %21, %18 : vector<8x1xf32>
    %cst_8 = arith.constant 0.00999999977 : f32
    %23 = vector.broadcast %cst_8 : f32 to vector<8x1xf32>
    %24 = arith.mulf %23, %22 : vector<8x1xf32>
    %25 = arith.addf %20, %24 : vector<8x1xf32>
    %c8_i32 = arith.constant 8 : i32
    %26 = arith.muli %arg0, %c8_i32 : i32
    %27 = tpu.iota {dimensions = array<i32: 0>} : vector<8x1xi32>
    %28 = vector.broadcast %26 : i32 to vector<8x1xi32>
    %29 = arith.addi %28, %27 : vector<8x1xi32>
    %c8_i32_9 = arith.constant 8 : i32
    %30 = vector.broadcast %c8_i32_9 : i32 to vector<8x1xi32>
    %31 = arith.cmpi slt, %29, %30 : vector<8x1xi32>
    %cst_10 = arith.constant 0.000000e+00 : f32
    %32 = vector.broadcast %cst_10 : f32 to vector<8x1xf32>
    %33 = arith.select %31, %25, %32 : vector<8x1xi1>, vector<8x1xf32>
    %34 = vector.shape_cast %33 : vector<8x1xf32> to vector<1x8x1xf32>
    %cst_11 = arith.constant dense<0.000000e+00> : vector<1xf32>
    %35 = vector.multi_reduction <add>, %34, %cst_11 [1, 2] : vector<1x8x1xf32> to vector<1xf32>
    %36 = vector.shape_cast %35 : vector<1xf32> to vector<1x1x1xf32>
    %37 = vector.extract %36[0, 0, 0] : f32 from vector<1x1x1xf32>
    %38 = vector.broadcast %37 : f32 to vector<1x1x128xf32>
    %c0_12 = arith.constant 0 : index
    %c0_13 = arith.constant 0 : index
    %c0_14 = arith.constant 0 : index
    %39 = vector.load %arg3[%c0_12, %c0_13, %c0_14] : memref<1x1x128xf32, #tpu.memory_space<vmem>>, vector<1x1x128xf32>
    tpu.vector_store %arg3[%c0_12, %c0_13, %c0_14], %38 {strides = array<i32>} : memref<1x1x128xf32, #tpu.memory_space<vmem>>, vector<1x1x128xf32>,
    return
  }
  func.func @transform_0(%arg0: i32) -> (i32, i32) {
    %c0_i32 = arith.constant 0 : i32
    %c0_i32_0 = arith.constant 0 : i32
    return %arg0, %c0_i32 : i32, i32
  }
  func.func @transform_1(%arg0: i32) -> (i32, i32) {
    %c0_i32 = arith.constant 0 : i32
    %c0_i32_0 = arith.constant 0 : i32
    return %arg0, %c0_i32 : i32, i32
  }
  func.func @transform_2(%arg0: i32) -> (i32, i32, i32) {
    %c0_i32 = arith.constant 0 : i32
    %c0_i32_0 = arith.constant 0 : i32
    %c0_i32_1 = arith.constant 0 : i32
    return %arg0, %c0_i32, %c0_i32_0 : i32, i32, i32
  }
}

</mosaic_0001>

<bundles_post_ra>
// kernel: tpu_custom_call.1
= control target key start
LH: loop header
LB: loop body
LE: loop exit
PB: predicated region body
PF: predicated region fallthrough
CT: control target
= control target key end

     0   :  { %vm14_vm0 = vcmask 130048   ;;  %s139_s0 = inlined_call_operand.vmem [shape: f32[8,16], index: 0, kind: input, shape index: {}]   ;;  %s140_s1 = inlined_call_operand.vmem [shape: s32[8,1], index: 1, kind: input, shape index: {}]   ;;  %s141_s2 = inlined_call_operand.hbm [shape: f32[1,1,128], index: 2, kind: output, shape index: {}]  }
   0x1   :  { %v12_v0 = vld [vmem:[%s139_s0] sm:$0xff] }
   0x2   :  { %7 = vsyncpa [#allocation3], 0  ;;  %v15_v1 = vsel %vm14_vm0, %v12_v0, -inf  ;;  %v110_v2 = vmov 0   ;;  %v13_v3 = vld [vmem:[%s140_s1] sm:$0xff]  ;;  %v24_v7 = vlaneseq  ;;  %vm50_vm2 = vcmask 7168  }
   0x3   :  { %81 = vset.pattern.permute.xlu0 %v110_v2  ;;  %s111_s0 = smov [#allocation2]  }
   0x4   :  { %16 = vmax.xlane.f32.xlu0 %v15_v1  ;;  %v25_v8 = vand.u32 127, %v24_v7  ;;  %s69_s1 = sshll.u32 %s111_s0, 4  ;;  %s70_s1 = int_to_ptr.vmem [resolvable:$true] %s69_s1 }
   0x5   :  { %s88_s14 = scalar_lea.vmem %s70_s1, 16  ;;  %s92_s15 = scalar_lea.vmem %s70_s1, 32 }
   0x6   :  { %p89_p0 = scmp.ne.s32.totalorder %s70_s1, %s88_s14  ;;  %p93_p1 = scmp.lt.s32.totalorder %s70_s1, %s70_s1 }
   0x7   :  { %p94_p2 = scmp.lt.s32.totalorder %s92_s15, %s88_s14 }
   0x9   :  { %p95_p3 = por %p94_p2, %p93_p1 }
   0xb   :  { %p96_p4 = pnand %p95_p3, %p89_p0 }
  0x1a   :  { %27 = vperm.xlu0 %81, %v13_v3  }
  0x8d   :  { %v17_v4 = vpop.xlane.xlu0 %16 }
  0x8e   :  { %v18_v5 = vsub.f32 %v12_v0, %v17_v4 }
  0x90   :  { %v19_v6 = vmul.f32 1.442695, %v18_v5 }
  0x92   :  { %82 = vpow2.f32 %v19_v6 }
  0x95   :  { %v28_v9 = vpop.permute.xlu0 %27 }
  0x96   :  { %vm29_vm1 = vcmp.eq.s32.totalorder %v25_v8, %v28_v9 }
  0x97   :  { %v30_v12 = vsel %vm29_vm1, %v18_v5, 0.0 }
  0x98   :  { %v31_v13 = vsel %vm14_vm0, %v30_v12, 0.0 }
  0x9f   :  { %v83_v10 = vpop.eup %82 }
  0xa0   :  { %v21_v11 = vsel %vm14_vm0, %v83_v10, 0.0 }
  0xa1   :  { %22 = vadd.xlane.f32.xlu1 %v21_v11 }
  0xa5   :  { %32 = vadd.xlane.f32.xlu1 %v31_v13 }
 0x12a   :  { %v23_v14 = vpop.xlane.xlu1 %22 }
 0x12b   :  { %84 = vlog2.f32 %v23_v14 }
 0x12e   :  { %v33_v17 = vpop.xlane.xlu1 %32 }
 0x138   :  { %v85_v15 = vpop.eup %84 }
 0x139   :  { %v35_v16 = vmul.f32 0.6931472, %v85_v15 }
 0x13b   :  { %v36_v18 = vsub.f32 %v33_v17, %v35_v16 }
 0x13d   :  { %v37_v19 = vmul.f32 1.442695, %v36_v18  ;;  %v39_v22 = vsub.f32 0.0, %v36_v18 }
 0x13f   :  { %86 = vpow2.f32 %v37_v19 }
 0x14c   :  { %v87_v20 = vpop.eup %86 }
 0x14d   :  { %v40_v21 = vsub.f32 1.0, %v87_v20 }
 0x14f   :  { %v41_v23 = vmul.f32 0.01, %v40_v21 }
 0x151   :  { %v42_v24 = vadd.f32 %v41_v23, %v39_v22 }
 0x153   :  { %v51_v25 = vsel %vm50_vm2, %v42_v24, 0.0 }
 0x154   :  { %52 = vadd.xlane.f32.xlu1 %v51_v25 }
 0x1dd   :  { %v53_v26 = vpop.xlane.xlu1 %52 }
 0x1de   :  { %v54_v27 = vrot.slane %v53_v26, 4 }
 0x1e0   :  { %v55_v28 = vadd.f32 %v54_v27, %v53_v26 }
 0x1e2   :  { %v56_v29 = vrot.slane %v55_v28, 2 }
 0x1e4   :  { %v57_v30 = vadd.f32 %v56_v29, %v55_v28 }
 0x1e6   :  { %v58_v31 = vrot.slane %v57_v30, 1 }
 0x1e8   :  { %v59_v32 = vadd.f32 %v58_v31, %v57_v30 }
 0x1ea   :  { %77 = vpush %v59_v32 }
 0x21b   :  { %s78_s13 = spop %77 }
 0x21c   :  { %v61_v33 = vstv %s78_s13 }
 0x21d   :  { %62 = vst [vmem:[#allocation2] sm:$0x1] %v61_v33 }
 0x21e   :  { %99 = shalt.err (!%p96_p4)
}
 0x21f   :  { %72 = dma.vmem_to_hbm [thread:$0]  %s70_s1, 16, %s141_s2, [#allocation3]  }
 0x220   :  { %108 = dma.done.wait [#allocation3], 16  }
 0x221   :  { %109 = vsyncadd [#allocation3], 4294967280 }
 0x222   :  { %76 = vsyncpa [#allocation3], 1 }

</bundles_post_ra>
